<compile_context>
chip_gen: v7x
topology: tpu7x:2x2x1
jax: 0.10.0
libtpu: 0.0.40
codegen_flags: <defaults>
</compile_context>

<pallas_src>
import functools

import jax
import jax.numpy as jnp
from jax.experimental import pallas as pl
from jax.experimental.pallas import tpu as pltpu

PARENT_MAPPING = (-1, 0, 0, 0, 0, 1, 5, 2, 7, 3, 9, 4, 11)
NJ = len(PARENT_MAPPING)          # 13 joints
BONE_DIM = 2
FEAT = 6                          # local_feature_size
HID = BONE_DIM + FEAT             # 8 (hidden width of every BoneMLP)

# Topological levels: parents of level k are exactly level k-1's joints in order
# (level 1's joints all share the single root parent).
LEVELS = ((0,), (1, 2, 3, 4), (5, 7, 9, 11), (6, 8, 10, 12))
LEVEL_ORDER = tuple(j for lvl in LEVELS for j in lvl)

X_ROWS = 32       # 4 levels x 8 rows of bone input (root padded 2 -> 8, row 7 == 1.0)
OUT_ROWS = 80     # 8 (root, padded 6 -> 8) + 3 * 24
MAX_TILE = 8192   # lane tile cap: double-buffered VMEM stays ~8 MiB, under all limits

# For each joint j (joint order), the 6 output rows in the level-packed layout.
ROW_INDEX = []
for _j in range(NJ):
    _k = LEVEL_ORDER.index(_j)
    _s = 0 if _k == 0 else 2 + 6 * _k      # level 0 at rows 0:8, then 24-row blocks
    ROW_INDEX.extend(range(_s, _s + FEAT))
ROW_INDEX = tuple(ROW_INDEX)


# --------------------------------------------------------------------------- #
# Kernel
# --------------------------------------------------------------------------- #
def structure_encoder_kernel(x_ref, w1r_ref, w2r_ref, b2r_ref,
                             w1l_ref, b1l_ref, w2l_ref, b2l_ref,
                             out_ref, rhs_ref, *, cdt):
    """One batch tile: whole kinematic tree, level-batched, batch on lanes.

    rhs_ref (VMEM scratch, [32, tb]) stages each level's fused layer-1 RHS:
      rows 0:8  = current level's bone inputs
      rows 8:32 = parent features (level 1: f0 in 8:16, row 15 == 1.0 carries b1)
    """
    f32 = jnp.float32

    def mm(w, x):
        # Explicit operand dtype (bf16 -> single-pass MXU), f32 accumulation.
        return jnp.dot(w.astype(cdt), x.astype(cdt), preferred_element_type=f32)

    tb = rhs_ref.shape[1]
    # Level-1's dot reads rows 16:32 against zero weight columns; zero them every
    # step so the first iteration on each core never multiplies uninitialized VMEM
    # (NaN * 0 = NaN).  16 rows of vst per tile: negligible.
    rhs_ref[16:32, :] = jnp.zeros((16, tb), f32)

    # ---- level 0 (root joint); b1 folded into w1r via the x row-7 == 1 trick ----
    x0 = x_ref[0:8, :]                                               # [8, tb]
    h0 = jnp.maximum(mm(w1r_ref[...], x0), 0.0)
    f0 = jnp.maximum(mm(w2r_ref[...], h0) + b2r_ref[...], 0.0)      # row 6 = 0, row 7 = 1
    out_ref[0:8, :] = f0
    rhs_ref[8:16, :] = f0

    # ---- levels 1..3: 4 joints each, one fused [32,32] @ [32,tb] layer-1 dot ----
    for lvl in range(3):                                             # static 3-iter loop
        rhs_ref[0:8, :] = x_ref[8 + 8 * lvl: 16 + 8 * lvl, :]        # stage bone inputs
        acc = mm(w1l_ref[lvl], rhs_ref[...])                         # [32, tb]
        if lvl > 0:                        # level-1 b1 is folded via f0's ones row
            acc = acc + b1l_ref[lvl - 1]
        h = jnp.maximum(acc, 0.0)
        f = jnp.maximum(mm(w2l_ref[lvl], h) + b2l_ref[lvl], 0.0)     # [24, tb]
        out_ref[8 + 24 * lvl: 32 + 24 * lvl, :] = f                  # aligned store
        if lvl < 2:
            rhs_ref[8:32, :] = f                                     # parents for next lvl


# --------------------------------------------------------------------------- #
# Wrapper-side packing (layout plumbing, pure XLA)
# --------------------------------------------------------------------------- #
def pack_params(w1, b1, w2, b2):
    """Per-joint params -> transposed, level-stacked block-diagonal weights (7 arrays)."""
    f32 = jnp.float32
    w1 = w1.astype(f32); b1 = b1.astype(f32)
    w2 = w2.astype(f32); b2 = b2.astype(f32)

    # Root: bias b1[0] folded into column 7 (the x block carries a ones row there);
    # b2_root row 7 = 1.0 so f0 row 7 == 1, which carries level-1's b1 for free.
    w1_root = w1[0].T.at[:, 7].set(b1[0])                            # [8, 8]
    w2_root = jnp.zeros((HID, HID), f32).at[:FEAT, :].set(w2[0].T)   # [8, 8]
    b2_root = (jnp.zeros((HID, 1), f32)
               .at[:FEAT, 0].set(b2[0])
               .at[HID - 1, 0].set(1.0))

    w1_lvls, b1_lvls, w2_lvls, b2_lvls = [], [], [], []
    for lvl, joints in enumerate(LEVELS[1:]):
        w1_l = jnp.zeros((4 * HID, X_ROWS), f32)         # [32, 32]: [bones | parent feats]
        b1_l = jnp.zeros((4 * HID, 1), f32)
        w2_l = jnp.zeros((4 * FEAT, 4 * HID), f32)       # [24, 32]
        b2_l = jnp.zeros((4 * FEAT, 1), f32)
        for a, j in enumerate(joints):
            w1_l = w1_l.at[8 * a:8 * a + 8, 2 * a:2 * a + 2].set(w1[j][:BONE_DIM, :].T)
            col = 8 if lvl == 0 else 8 + 6 * a           # level 1: all parents = root
            w1_l = w1_l.at[8 * a:8 * a + 8, col:col + FEAT].set(w1[j][BONE_DIM:, :].T)
            if lvl == 0:
                # scratch row 15 == f0 row 7 == 1.0 -> bias folded into the fused dot
                w1_l = w1_l.at[8 * a:8 * a + 8, 15].set(b1[j])
            else:
                b1_l = b1_l.at[8 * a:8 * a + 8, 0].set(b1[j])
            w2_l = w2_l.at[6 * a:6 * a + 6, 8 * a:8 * a + 8].set(w2[j].T)
            b2_l = b2_l.at[6 * a:6 * a + 6, 0].set(b2[j])
        w1_lvls.append(w1_l); b1_lvls.append(b1_l)
        w2_lvls.append(w2_l); b2_lvls.append(b2_l)

    return (w1_root, w2_root, b2_root,
            jnp.stack(w1_lvls),        # [3, 32, 32]
            jnp.stack(b1_lvls[1:]),    # [2, 32, 1]   (levels 2, 3 only)
            jnp.stack(w2_lvls),        # [3, 24, 32]
            jnp.stack(b2_lvls))        # [3, 24, 1]


def _round_up(n, m):
    return (n + m - 1) // m * m


def _pick_batch_tile(bp0):
    """Largest 128-multiple lane tile (<= MAX_TILE) that still gives >= 2 grid steps."""
    if bp0 <= 128:
        return 128
    steps = max(2, pl.cdiv(bp0, MAX_TILE))      # >= 2 so v7x's two TCs both get work
    return int(min(_round_up(pl.cdiv(bp0, steps), 128), MAX_TILE))


def structure_encoder(x, w1, b1, w2, b2, *, batch_tile=None,
                      compute_dtype=jnp.float32, packed_output=False):
    """x: [B, NJ, BONE_DIM] -> [B, NJ*FEAT] (== torch.cat(features, dim=-1)).

    compute_dtype=jnp.bfloat16 uses bf16 dot operands (single-pass MXU); keeps f32
    accumulation, VMEM layout and output dtype.  packed_output=True returns the
    level-packed [80, B] slab (rows per ROW_INDEX) so a fused consumer can skip the
    gather+transpose pass.
    """
    B = x.shape[0]
    weights = pack_params(w1, b1, w2, b2)

    # Lane-dense input: batch on lanes, level-packed joint bones on sublanes.
    xt = jnp.transpose(x.astype(jnp.float32), (1, 2, 0))             # [NJ, 2, B]
    root = (jnp.zeros((HID, B), jnp.float32)
            .at[0:BONE_DIM, :].set(xt[0])
            .at[HID - 1, :].set(1.0))                                # ones row -> root b1
    blocks = [root]
    for joints in LEVELS[1:]:
        blocks.append(xt[jnp.asarray(joints)].reshape(4 * BONE_DIM, B))
    x_lvl = jnp.concatenate(blocks, axis=0)                          # [32, B]

    Bp0 = _round_up(max(B, 1), 128)
    tb = int(batch_tile) if batch_tile is not None else _pick_batch_tile(Bp0)
    Bp = _round_up(Bp0, tb)                                          # pad up, no % tb req.
    x_lvl = jnp.pad(x_lvl, ((0, 0), (0, Bp - B)))                    # [32, Bp]

    in_specs = [pl.BlockSpec((X_ROWS, tb), lambda i: (0, i))]
    # Weights: full-array blocks, constant index_maps -> DMA'd once, VMEM-resident.
    in_specs += [pl.BlockSpec(w.shape, lambda i, nd=w.ndim: (0,) * nd) for w in weights]

    out_lvl = pl.pallas_call(
        functools.partial(structure_encoder_kernel, cdt=compute_dtype),
        out_shape=jax.ShapeDtypeStruct((OUT_ROWS, Bp), jnp.float32),
        grid=(Bp // tb,),
        in_specs=in_specs,
        out_specs=pl.BlockSpec((OUT_ROWS, tb), lambda i: (0, i)),
        scratch_shapes=[pltpu.VMEM((X_ROWS, tb), jnp.float32)],      # fused layer-1 RHS
        compiler_params=pltpu.CompilerParams(
            dimension_semantics=("parallel",)),                      # v7x: 2 TCs share batch
    )(x_lvl, *weights)

    if packed_output:
        # NOTE: padded lanes hold relu(bias) garbage, so the :B slice must be kept.
        return out_lvl[:, :B]
    # Back to [B, NJ*FEAT] in joint order.  Gather + transpose are pure layout ops
    # that XLA fuses into one copy pass over the output.
    return out_lvl[jnp.asarray(ROW_INDEX), :B].T


# --------------------------------------------------------------------------- #
# Params + pure-JAX reference (mirrors the PyTorch forward exactly)
# --------------------------------------------------------------------------- #
def init_params(key):
    """Deterministic per-joint Linear params (PyTorch-style uniform bounds)."""
    w1s, b1s, w2s, b2s = [], [], [], []
    for i in range(NJ):
        key, k1, k2, k3, k4 = jax.random.split(key, 5)
        in_f = BONE_DIM if PARENT_MAPPING[i] == -1 else BONE_DIM + FEAT
        bound1 = 1.0 / float(in_f) ** 0.5
        w1_i = jax.random.uniform(k1, (in_f, HID), jnp.float32, -bound1, bound1)
        if in_f < HID:                               # root joint: zero-pad input rows
            w1_i = jnp.pad(w1_i, ((0, HID - in_f), (0, 0)))
        b1_i = jax.random.uniform(k2, (HID,), jnp.float32, -bound1, bound1)
        bound2 = 1.0 / float(HID) ** 0.5
        w2_i = jax.random.uniform(k3, (HID, FEAT), jnp.float32, -bound2, bound2)
        b2_i = jax.random.uniform(k4, (FEAT,), jnp.float32, -bound2, bound2)
        w1s.append(w1_i); b1s.append(b1_i); w2s.append(w2_i); b2s.append(b2_i)
    return jnp.stack(w1s), jnp.stack(b1s), jnp.stack(w2s), jnp.stack(b2s)


def structure_encoder_ref(x, w1, b1, w2, b2):
    B = x.shape[0]
    feats = [None] * NJ
    for i in range(NJ):
        p = PARENT_MAPPING[i]
        xi = x[:, i, :]
        if p == -1:
            inp = jnp.concatenate([xi, jnp.zeros((B, FEAT), x.dtype)], axis=-1)
        else:
            inp = jnp.concatenate([xi, feats[p]], axis=-1)
        h = jax.nn.relu(inp @ w1[i] + b1[i])
        feats[i] = jax.nn.relu(h @ w2[i] + b2[i])
    return jnp.concatenate(feats, axis=-1)


if __name__ == "__main__":
    key = jax.random.PRNGKey(0)
    kp, kx = jax.random.split(key)
    w1, b1, w2, b2 = init_params(kp)

    for B in (4, 384):        # tiny case + a case exercising padding & a 2-step grid
        kx, kb = jax.random.split(kx)
        x = jax.random.normal(kb, (B, NJ, BONE_DIM), dtype=jnp.float32)
        ref = structure_encoder_ref(x, w1, b1, w2, b2)

        out = jax.block_until_ready(structure_encoder(x, w1, b1, w2, b2))
        assert out.shape == (B, NJ * FEAT), out.shape
        assert jnp.allclose(out, ref, atol=1e-4, rtol=1e-4), f"f32 mismatch (B={B})"

        out_bf16 = jax.block_until_ready(
            structure_encoder(x, w1, b1, w2, b2, compute_dtype=jnp.bfloat16))
        assert jnp.allclose(out_bf16, ref, atol=5e-2, rtol=5e-2), f"bf16 mismatch (B={B})"

    print("KERNEL_OK")
</pallas_src>

<mosaic_0001>
module attributes {stable_mosaic.version = 11 : i64} {
  func.func @structure_encoder_kernel(%arg0: i32, %arg1: memref<32x128xf32, #tpu.memory_space<vmem>>, %arg2: memref<8x8xf32, #tpu.memory_space<vmem>>, %arg3: memref<8x8xf32, #tpu.memory_space<vmem>>, %arg4: memref<8x1xf32, #tpu.memory_space<vmem>>, %arg5: memref<3x32x32xf32, #tpu.memory_space<vmem>>, %arg6: memref<2x32x1xf32, #tpu.memory_space<vmem>>, %arg7: memref<3x24x32xf32, #tpu.memory_space<vmem>>, %arg8: memref<3x24x1xf32, #tpu.memory_space<vmem>>, %arg9: memref<80x128xf32, #tpu.memory_space<vmem>>, %arg10: memref<32x128xf32, #tpu.memory_space<vmem>>) attributes {dimension_semantics = [#tpu.dimension_semantics<parallel>], iteration_bounds = array<i64: 1>, scalar_prefetch = 0 : i64, scratch_operands = 1 : i64, tpu.core_type = #tpu.core_type<tc>, window_params = [{transform_indices = @transform_0, window_bounds = array<i64: 32, 128>}, {pipeline_mode = #tpu.pipeline_mode<synchronous>, transform_indices = @transform_1, window_bounds = array<i64: 8, 8>}, {pipeline_mode = #tpu.pipeline_mode<synchronous>, transform_indices = @transform_2, window_bounds = array<i64: 8, 8>}, {pipeline_mode = #tpu.pipeline_mode<synchronous>, transform_indices = @transform_3, window_bounds = array<i64: 8, 1>}, {pipeline_mode = #tpu.pipeline_mode<synchronous>, transform_indices = @transform_4, window_bounds = array<i64: 3, 32, 32>}, {pipeline_mode = #tpu.pipeline_mode<synchronous>, transform_indices = @transform_5, window_bounds = array<i64: 2, 32, 1>}, {pipeline_mode = #tpu.pipeline_mode<synchronous>, transform_indices = @transform_6, window_bounds = array<i64: 3, 24, 32>}, {pipeline_mode = #tpu.pipeline_mode<synchronous>, transform_indices = @transform_7, window_bounds = array<i64: 3, 24, 1>}, {transform_indices = @transform_8, window_bounds = array<i64: 80, 128>}]} {
    %cst = arith.constant 0.000000e+00 : f32
    %0 = vector.broadcast %cst : f32 to vector<16x128xf32>
    %c16 = arith.constant 16 : index
    %c0 = arith.constant 0 : index
    %1 = vector.load %arg10[%c16, %c0] : memref<32x128xf32, #tpu.memory_space<vmem>>, vector<16x128xf32>
    tpu.vector_store %arg10[%c16, %c0], %0 {strides = array<i32>} : memref<32x128xf32, #tpu.memory_space<vmem>>, vector<16x128xf32>,
    %c0_0 = arith.constant 0 : index
    %c0_1 = arith.constant 0 : index
    %2 = vector.load %arg1[%c0_0, %c0_1] : memref<32x128xf32, #tpu.memory_space<vmem>>, vector<8x128xf32>
    %c0_2 = arith.constant 0 : index
    %c0_3 = arith.constant 0 : index
    %3 = vector.load %arg2[%c0_2, %c0_3] : memref<8x8xf32, #tpu.memory_space<vmem>>, vector<8x8xf32>
    %cst_4 = arith.constant dense<0.000000e+00> : vector<8x128xf32>
    %4 = tpu.matmul %3, %2, %cst_4 {dimension_numbers = #tpu.dot_dimension_numbers<[1], [0], [0], [1], [0, 0, 1, 1], [], []>} : vector<8x8xf32>, vector<8x128xf32>, vector<8x128xf32> -> vector<8x128xf32>
    %cst_5 = arith.constant 0.000000e+00 : f32
    %5 = vector.broadcast %cst_5 : f32 to vector<8x128xf32>
    %6 = arith.maximumf %4, %5 : vector<8x128xf32>
    %c0_6 = arith.constant 0 : index
    %c0_7 = arith.constant 0 : index
    %7 = vector.load %arg3[%c0_6, %c0_7] : memref<8x8xf32, #tpu.memory_space<vmem>>, vector<8x8xf32>
    %cst_8 = arith.constant dense<0.000000e+00> : vector<8x128xf32>
    %8 = tpu.matmul %7, %6, %cst_8 {dimension_numbers = #tpu.dot_dimension_numbers<[1], [0], [0], [1], [0, 0, 1, 1], [], []>} : vector<8x8xf32>, vector<8x128xf32>, vector<8x128xf32> -> vector<8x128xf32>
    %c0_9 = arith.constant 0 : index
    %c0_10 = arith.constant 0 : index
    %9 = vector.load %arg4[%c0_9, %c0_10] : memref<8x1xf32, #tpu.memory_space<vmem>>, vector<8x1xf32>
    %10 = vector.broadcast %9 : vector<8x1xf32> to vector<8x128xf32>
    %11 = arith.addf %8, %10 : vector<8x128xf32>
    %cst_11 = arith.constant 0.000000e+00 : f32
    %12 = vector.broadcast %cst_11 : f32 to vector<8x128xf32>
    %13 = arith.maximumf %11, %12 : vector<8x128xf32>
    %c0_12 = arith.constant 0 : index
    %c0_13 = arith.constant 0 : index
    %14 = vector.load %arg9[%c0_12, %c0_13] : memref<80x128xf32, #tpu.memory_space<vmem>>, vector<8x128xf32>
    tpu.vector_store %arg9[%c0_12, %c0_13], %13 {strides = array<i32>} : memref<80x128xf32, #tpu.memory_space<vmem>>, vector<8x128xf32>,
    %c8 = arith.constant 8 : index
    %c0_14 = arith.constant 0 : index
    %15 = vector.load %arg10[%c8, %c0_14] : memref<32x128xf32, #tpu.memory_space<vmem>>, vector<8x128xf32>
    tpu.vector_store %arg10[%c8, %c0_14], %13 {strides = array<i32>} : memref<32x128xf32, #tpu.memory_space<vmem>>, vector<8x128xf32>,
    %c8_15 = arith.constant 8 : index
    %c0_16 = arith.constant 0 : index
    %16 = vector.load %arg1[%c8_15, %c0_16] : memref<32x128xf32, #tpu.memory_space<vmem>>, vector<8x128xf32>
    %c0_17 = arith.constant 0 : index
    %c0_18 = arith.constant 0 : index
    %17 = vector.load %arg10[%c0_17, %c0_18] : memref<32x128xf32, #tpu.memory_space<vmem>>, vector<8x128xf32>
    tpu.vector_store %arg10[%c0_17, %c0_18], %16 {strides = array<i32>} : memref<32x128xf32, #tpu.memory_space<vmem>>, vector<8x128xf32>,
    %c0_19 = arith.constant 0 : index
    %c0_20 = arith.constant 0 : index
    %c0_21 = arith.constant 0 : index
    %18 = vector.load %arg5[%c0_19, %c0_20, %c0_21] : memref<3x32x32xf32, #tpu.memory_space<vmem>>, vector<1x32x32xf32>
    %19 = vector.shape_cast %18 : vector<1x32x32xf32> to vector<32x32xf32>
    %c0_22 = arith.constant 0 : index
    %c0_23 = arith.constant 0 : index
    %20 = vector.load %arg10[%c0_22, %c0_23] : memref<32x128xf32, #tpu.memory_space<vmem>>, vector<32x128xf32>
    %cst_24 = arith.constant dense<0.000000e+00> : vector<32x128xf32>
    %21 = tpu.matmul %19, %20, %cst_24 {dimension_numbers = #tpu.dot_dimension_numbers<[1], [0], [0], [1], [0, 0, 1, 1], [], []>} : vector<32x32xf32>, vector<32x128xf32>, vector<32x128xf32> -> vector<32x128xf32>
    %cst_25 = arith.constant 0.000000e+00 : f32
    %22 = vector.broadcast %cst_25 : f32 to vector<32x128xf32>
    %23 = arith.maximumf %21, %22 : vector<32x128xf32>
    %c0_26 = arith.constant 0 : index
    %c0_27 = arith.constant 0 : index
    %c0_28 = arith.constant 0 : index
    %24 = vector.load %arg7[%c0_26, %c0_27, %c0_28] : memref<3x24x32xf32, #tpu.memory_space<vmem>>, vector<1x24x32xf32>
    %25 = vector.shape_cast %24 : vector<1x24x32xf32> to vector<24x32xf32>
    %cst_29 = arith.constant dense<0.000000e+00> : vector<24x128xf32>
    %26 = tpu.matmul %25, %23, %cst_29 {dimension_numbers = #tpu.dot_dimension_numbers<[1], [0], [0], [1], [0, 0, 1, 1], [], []>} : vector<24x32xf32>, vector<32x128xf32>, vector<24x128xf32> -> vector<24x128xf32>
    %c0_30 = arith.constant 0 : index
    %c0_31 = arith.constant 0 : index
    %c0_32 = arith.constant 0 : index
    %27 = vector.load %arg8[%c0_30, %c0_31, %c0_32] : memref<3x24x1xf32, #tpu.memory_space<vmem>>, vector<1x24x1xf32>
    %28 = vector.shape_cast %27 : vector<1x24x1xf32> to vector<24x1xf32>
    %29 = vector.broadcast %28 : vector<24x1xf32> to vector<24x128xf32>
    %30 = arith.addf %26, %29 : vector<24x128xf32>
    %cst_33 = arith.constant 0.000000e+00 : f32
    %31 = vector.broadcast %cst_33 : f32 to vector<24x128xf32>
    %32 = arith.maximumf %30, %31 : vector<24x128xf32>
    %c8_34 = arith.constant 8 : index
    %c0_35 = arith.constant 0 : index
    %33 = vector.load %arg9[%c8_34, %c0_35] : memref<80x128xf32, #tpu.memory_space<vmem>>, vector<24x128xf32>
    tpu.vector_store %arg9[%c8_34, %c0_35], %32 {strides = array<i32>} : memref<80x128xf32, #tpu.memory_space<vmem>>, vector<24x128xf32>,
    %c8_36 = arith.constant 8 : index
    %c0_37 = arith.constant 0 : index
    %34 = vector.load %arg10[%c8_36, %c0_37] : memref<32x128xf32, #tpu.memory_space<vmem>>, vector<24x128xf32>
    tpu.vector_store %arg10[%c8_36, %c0_37], %32 {strides = array<i32>} : memref<32x128xf32, #tpu.memory_space<vmem>>, vector<24x128xf32>,
    %c16_38 = arith.constant 16 : index
    %c0_39 = arith.constant 0 : index
    %35 = vector.load %arg1[%c16_38, %c0_39] : memref<32x128xf32, #tpu.memory_space<vmem>>, vector<8x128xf32>
    %c0_40 = arith.constant 0 : index
    %c0_41 = arith.constant 0 : index
    %36 = vector.load %arg10[%c0_40, %c0_41] : memref<32x128xf32, #tpu.memory_space<vmem>>, vector<8x128xf32>
    tpu.vector_store %arg10[%c0_40, %c0_41], %35 {strides = array<i32>} : memref<32x128xf32, #tpu.memory_space<vmem>>, vector<8x128xf32>,
    %c1 = arith.constant 1 : index
    %c0_42 = arith.constant 0 : index
    %c0_43 = arith.constant 0 : index
    %37 = vector.load %arg5[%c1, %c0_42, %c0_43] : memref<3x32x32xf32, #tpu.memory_space<vmem>>, vector<1x32x32xf32>
    %38 = vector.shape_cast %37 : vector<1x32x32xf32> to vector<32x32xf32>
    %c0_44 = arith.constant 0 : index
    %c0_45 = arith.constant 0 : index
    %39 = vector.load %arg10[%c0_44, %c0_45] : memref<32x128xf32, #tpu.memory_space<vmem>>, vector<32x128xf32>
    %cst_46 = arith.constant dense<0.000000e+00> : vector<32x128xf32>
    %40 = tpu.matmul %38, %39, %cst_46 {dimension_numbers = #tpu.dot_dimension_numbers<[1], [0], [0], [1], [0, 0, 1, 1], [], []>} : vector<32x32xf32>, vector<32x128xf32>, vector<32x128xf32> -> vector<32x128xf32>
    %c0_47 = arith.constant 0 : index
    %c0_48 = arith.constant 0 : index
    %c0_49 = arith.constant 0 : index
    %41 = vector.load %arg6[%c0_47, %c0_48, %c0_49] : memref<2x32x1xf32, #tpu.memory_space<vmem>>, vector<1x32x1xf32>
    %42 = vector.shape_cast %41 : vector<1x32x1xf32> to vector<32x1xf32>
    %43 = vector.broadcast %42 : vector<32x1xf32> to vector<32x128xf32>
    %44 = arith.addf %40, %43 : vector<32x128xf32>
    %cst_50 = arith.constant 0.000000e+00 : f32
    %45 = vector.broadcast %cst_50 : f32 to vector<32x128xf32>
    %46 = arith.maximumf %44, %45 : vector<32x128xf32>
    %c1_51 = arith.constant 1 : index
    %c0_52 = arith.constant 0 : index
    %c0_53 = arith.constant 0 : index
    %47 = vector.load %arg7[%c1_51, %c0_52, %c0_53] : memref<3x24x32xf32, #tpu.memory_space<vmem>>, vector<1x24x32xf32>
    %48 = vector.shape_cast %47 : vector<1x24x32xf32> to vector<24x32xf32>
    %cst_54 = arith.constant dense<0.000000e+00> : vector<24x128xf32>
    %49 = tpu.matmul %48, %46, %cst_54 {dimension_numbers = #tpu.dot_dimension_numbers<[1], [0], [0], [1], [0, 0, 1, 1], [], []>} : vector<24x32xf32>, vector<32x128xf32>, vector<24x128xf32> -> vector<24x128xf32>
    %c1_55 = arith.constant 1 : index
    %c0_56 = arith.constant 0 : index
    %c0_57 = arith.constant 0 : index
    %50 = vector.load %arg8[%c1_55, %c0_56, %c0_57] : memref<3x24x1xf32, #tpu.memory_space<vmem>>, vector<1x24x1xf32>
    %51 = vector.shape_cast %50 : vector<1x24x1xf32> to vector<24x1xf32>
    %52 = vector.broadcast %51 : vector<24x1xf32> to vector<24x128xf32>
    %53 = arith.addf %49, %52 : vector<24x128xf32>
    %cst_58 = arith.constant 0.000000e+00 : f32
    %54 = vector.broadcast %cst_58 : f32 to vector<24x128xf32>
    %55 = arith.maximumf %53, %54 : vector<24x128xf32>
    %c32 = arith.constant 32 : index
    %c0_59 = arith.constant 0 : index
    %56 = vector.load %arg9[%c32, %c0_59] : memref<80x128xf32, #tpu.memory_space<vmem>>, vector<24x128xf32>
    tpu.vector_store %arg9[%c32, %c0_59], %55 {strides = array<i32>} : memref<80x128xf32, #tpu.memory_space<vmem>>, vector<24x128xf32>,
    %c8_60 = arith.constant 8 : index
    %c0_61 = arith.constant 0 : index
    %57 = vector.load %arg10[%c8_60, %c0_61] : memref<32x128xf32, #tpu.memory_space<vmem>>, vector<24x128xf32>
    tpu.vector_store %arg10[%c8_60, %c0_61], %55 {strides = array<i32>} : memref<32x128xf32, #tpu.memory_space<vmem>>, vector<24x128xf32>,
    %c24 = arith.constant 24 : index
    %c0_62 = arith.constant 0 : index
    %58 = vector.load %arg1[%c24, %c0_62] : memref<32x128xf32, #tpu.memory_space<vmem>>, vector<8x128xf32>
    %c0_63 = arith.constant 0 : index
    %c0_64 = arith.constant 0 : index
    %59 = vector.load %arg10[%c0_63, %c0_64] : memref<32x128xf32, #tpu.memory_space<vmem>>, vector<8x128xf32>
    tpu.vector_store %arg10[%c0_63, %c0_64], %58 {strides = array<i32>} : memref<32x128xf32, #tpu.memory_space<vmem>>, vector<8x128xf32>,
    %c2 = arith.constant 2 : index
    %c0_65 = arith.constant 0 : index
    %c0_66 = arith.constant 0 : index
    %60 = vector.load %arg5[%c2, %c0_65, %c0_66] : memref<3x32x32xf32, #tpu.memory_space<vmem>>, vector<1x32x32xf32>
    %61 = vector.shape_cast %60 : vector<1x32x32xf32> to vector<32x32xf32>
    %c0_67 = arith.constant 0 : index
    %c0_68 = arith.constant 0 : index
    %62 = vector.load %arg10[%c0_67, %c0_68] : memref<32x128xf32, #tpu.memory_space<vmem>>, vector<32x128xf32>
    %cst_69 = arith.constant dense<0.000000e+00> : vector<32x128xf32>
    %63 = tpu.matmul %61, %62, %cst_69 {dimension_numbers = #tpu.dot_dimension_numbers<[1], [0], [0], [1], [0, 0, 1, 1], [], []>} : vector<32x32xf32>, vector<32x128xf32>, vector<32x128xf32> -> vector<32x128xf32>
    %c1_70 = arith.constant 1 : index
    %c0_71 = arith.constant 0 : index
    %c0_72 = arith.constant 0 : index
    %64 = vector.load %arg6[%c1_70, %c0_71, %c0_72] : memref<2x32x1xf32, #tpu.memory_space<vmem>>, vector<1x32x1xf32>
    %65 = vector.shape_cast %64 : vector<1x32x1xf32> to vector<32x1xf32>
    %66 = vector.broadcast %65 : vector<32x1xf32> to vector<32x128xf32>
    %67 = arith.addf %63, %66 : vector<32x128xf32>
    %cst_73 = arith.constant 0.000000e+00 : f32
    %68 = vector.broadcast %cst_73 : f32 to vector<32x128xf32>
    %69 = arith.maximumf %67, %68 : vector<32x128xf32>
    %c2_74 = arith.constant 2 : index
    %c0_75 = arith.constant 0 : index
    %c0_76 = arith.constant 0 : index
    %70 = vector.load %arg7[%c2_74, %c0_75, %c0_76] : memref<3x24x32xf32, #tpu.memory_space<vmem>>, vector<1x24x32xf32>
    %71 = vector.shape_cast %70 : vector<1x24x32xf32> to vector<24x32xf32>
    %cst_77 = arith.constant dense<0.000000e+00> : vector<24x128xf32>
    %72 = tpu.matmul %71, %69, %cst_77 {dimension_numbers = #tpu.dot_dimension_numbers<[1], [0], [0], [1], [0, 0, 1, 1], [], []>} : vector<24x32xf32>, vector<32x128xf32>, vector<24x128xf32> -> vector<24x128xf32>
    %c2_78 = arith.constant 2 : index
    %c0_79 = arith.constant 0 : index
    %c0_80 = arith.constant 0 : index
    %73 = vector.load %arg8[%c2_78, %c0_79, %c0_80] : memref<3x24x1xf32, #tpu.memory_space<vmem>>, vector<1x24x1xf32>
    %74 = vector.shape_cast %73 : vector<1x24x1xf32> to vector<24x1xf32>
    %75 = vector.broadcast %74 : vector<24x1xf32> to vector<24x128xf32>
    %76 = arith.addf %72, %75 : vector<24x128xf32>
    %cst_81 = arith.constant 0.000000e+00 : f32
    %77 = vector.broadcast %cst_81 : f32 to vector<24x128xf32>
    %78 = arith.maximumf %76, %77 : vector<24x128xf32>
    %c56 = arith.constant 56 : index
    %c0_82 = arith.constant 0 : index
    %79 = vector.load %arg9[%c56, %c0_82] : memref<80x128xf32, #tpu.memory_space<vmem>>, vector<24x128xf32>
    tpu.vector_store %arg9[%c56, %c0_82], %78 {strides = array<i32>} : memref<80x128xf32, #tpu.memory_space<vmem>>, vector<24x128xf32>,
    return
  }
  func.func @transform_0(%arg0: i32) -> (i32, i32) {
    %c0_i32 = arith.constant 0 : i32
    %c0_i32_0 = arith.constant 0 : i32
    return %c0_i32, %arg0 : i32, i32
  }
  func.func @transform_1(%arg0: i32) -> (i32, i32) {
    %c0_i32 = arith.constant 0 : i32
    %c0_i32_0 = arith.constant 0 : i32
    %c0_i32_1 = arith.constant 0 : i32
    return %c0_i32, %c0_i32_0 : i32, i32
  }
  func.func @transform_2(%arg0: i32) -> (i32, i32) {
    %c0_i32 = arith.constant 0 : i32
    %c0_i32_0 = arith.constant 0 : i32
    %c0_i32_1 = arith.constant 0 : i32
    return %c0_i32, %c0_i32_0 : i32, i32
  }
  func.func @transform_3(%arg0: i32) -> (i32, i32) {
    %c0_i32 = arith.constant 0 : i32
    %c0_i32_0 = arith.constant 0 : i32
    %c0_i32_1 = arith.constant 0 : i32
    return %c0_i32, %c0_i32_0 : i32, i32
  }
  func.func @transform_4(%arg0: i32) -> (i32, i32, i32) {
    %c0_i32 = arith.constant 0 : i32
    %c0_i32_0 = arith.constant 0 : i32
    %c0_i32_1 = arith.constant 0 : i32
    %c0_i32_2 = arith.constant 0 : i32
    return %c0_i32, %c0_i32_0, %c0_i32_1 : i32, i32, i32
  }
  func.func @transform_5(%arg0: i32) -> (i32, i32, i32) {
    %c0_i32 = arith.constant 0 : i32
    %c0_i32_0 = arith.constant 0 : i32
    %c0_i32_1 = arith.constant 0 : i32
    %c0_i32_2 = arith.constant 0 : i32
    return %c0_i32, %c0_i32_0, %c0_i32_1 : i32, i32, i32
  }
  func.func @transform_6(%arg0: i32) -> (i32, i32, i32) {
    %c0_i32 = arith.constant 0 : i32
    %c0_i32_0 = arith.constant 0 : i32
    %c0_i32_1 = arith.constant 0 : i32
    %c0_i32_2 = arith.constant 0 : i32
    return %c0_i32, %c0_i32_0, %c0_i32_1 : i32, i32, i32
  }
  func.func @transform_7(%arg0: i32) -> (i32, i32, i32) {
    %c0_i32 = arith.constant 0 : i32
    %c0_i32_0 = arith.constant 0 : i32
    %c0_i32_1 = arith.constant 0 : i32
    %c0_i32_2 = arith.constant 0 : i32
    return %c0_i32, %c0_i32_0, %c0_i32_1 : i32, i32, i32
  }
  func.func @transform_8(%arg0: i32) -> (i32, i32) {
    %c0_i32 = arith.constant 0 : i32
    %c0_i32_0 = arith.constant 0 : i32
    return %c0_i32, %arg0 : i32, i32
  }
}

</mosaic_0001>

<bundles_post_ra>
// kernel: tpu_custom_call.1
= control target key start
LH: loop header
LB: loop body
LE: loop exit
PB: predicated region body
PF: predicated region fallthrough
CT: control target
= control target key end

     0   :  { %13 = vsyncpa [#allocation4], 0  ;;  %s1619_s0 = inlined_call_operand.hbm [shape: f32[32,128], index: 0, kind: input, shape index: {}]   ;;  %s1620_s1 = inlined_call_operand.hbm [shape: f32[8,8], index: 1, kind: input, shape index: {}]   ;;  %s1621_s2 = inlined_call_operand.hbm [shape: f32[8,8], index: 2, kind: input, shape index: {}]   ;;  %s1622_s3 = inlined_call_operand.vmem [shape: f32[8,1], index: 3, kind: input, shape index: {}]   ;;  %s1623_s4 = inlined_call_operand.vmem [shape: f32[3,32,32], index: 4, kind: input, shape index: {}]   ;;  %s1624_s5 = inlined_call_operand.vmem [shape: f32[2,32,1], index: 5, kind: input, shape index: {}]   ;;  %s1625_s6 = inlined_call_operand.vmem [shape: f32[3,24,32], index: 6, kind: input, shape index: {}]   ;;  %s1626_s7 = inlined_call_operand.vmem [shape: f32[3,24,1], index: 7, kind: input, shape index: {}]   ;;  %s1627_s8 = inlined_call_operand.hbm [shape: f32[80,128], index: 8, kind: output, shape index: {}]  }
   0x1   :  { %14 = vsyncpa [#allocation7], 0 }
   0x2   :  { %15 = vsyncpa [#allocation5], 0  ;;  %s1331_s27 = smov [#allocation6]   ;;  %s1332_s29 = smov [#allocation3]  }
   0x3   :  { %s34_s28 = sshll.u32 %s1331_s27, 4  ;;  %s21_s30 = sshll.u32 %s1332_s29, 4  ;;  %s35_s28 = int_to_ptr.vmem [resolvable:$true] %s34_s28  ;;  %s1386_s30 = int_to_ptr.vmem [resolvable:$true] %s21_s30 }
   0x4   :  { %s1237_s11 = scalar_lea.hbm %s1620_s1, 128 }
   0x5   :  { %p1238_p0 = scmp.ne.s32.totalorder %s1620_s1, %s1237_s11  ;;  %p1241_p1 = scmp.lt.u32.totalorder %s1237_s11, %s1620_s1 }
   0x7   :  { %p1243_p2 = pnand %p1241_p1, %p1238_p0 }
   0x9   :  { %1246 = shalt.err (!%p1243_p2)
}
   0xa   :  { %s1247_s16 = scalar_lea.vmem %s35_s28, 128  ;;  %p1252_p4 = scmp.lt.s32.totalorder %s35_s28, %s35_s28 }
   0xb   :  { %p1248_p3 = scmp.ne.s32.totalorder %s35_s28, %s1247_s16  ;;  %p1253_p5 = scmp.lt.s32.totalorder %s1247_s16, %s1247_s16 }
   0xd   :  { %p1254_p6 = por %p1253_p5, %p1252_p4 }
   0xf   :  { %p1255_p7 = pnand %p1254_p6, %p1248_p3 }
  0x11   :  { %1258 = shalt.err (!%p1255_p7)
}
  0x12   :  { %37 = dma.hbm_to_vmem [thread:$0]  %s1620_s1, 128, %s35_s28, [#allocation7]  }
  0x13   :  { %s1259_s21 = scalar_lea.hbm %s1619_s0, 512 }
  0x14   :  { %p1260_p8 = scmp.ne.s32.totalorder %s1619_s0, %s1259_s21  ;;  %p1263_p9 = scmp.lt.u32.totalorder %s1259_s21, %s1619_s0 }
  0x16   :  { %p1265_p10 = pnand %p1263_p9, %p1260_p8 }
  0x18   :  { %1268 = shalt.err (!%p1265_p10)
}
  0x19   :  { %s1269_s26 = scalar_lea.vmem %s1386_s30, 512  ;;  %p1274_p12 = scmp.lt.s32.totalorder %s1386_s30, %s1386_s30 }
  0x1a   :  { %p1270_p11 = scmp.ne.s32.totalorder %s1386_s30, %s1269_s26  ;;  %p1275_p13 = scmp.lt.s32.totalorder %s1269_s26, %s1269_s26 }
  0x1c   :  { %p1276_p0 = por %p1275_p13, %p1274_p12 }
  0x1e   :  { %p1277_p1 = pnand %p1276_p0, %p1270_p11 }
  0x20   :  { %1280 = shalt.err (!%p1277_p1)
}
  0x21   :  { %s1333_s1 = smov 128   ;;  %s1334_s27 = smov 8  }
  0x22   :  { %27 = dma.hbm_to_vmem [thread:$0]  %s1619_s0, 512, %s1386_s30, [#allocation4], %s1333_s1, %s1333_s1, %s1334_s27  }
  0x23   :  { %s1335_s9 = smov [#allocation8]   ;;  %s1281_s13 = scalar_lea.hbm %s1621_s2, 128 }
  0x24   :  { %s44_s10 = sshll.u32 %s1335_s9, 4  ;;  %p1282_p2 = scmp.ne.s32.totalorder %s1621_s2, %s1281_s13  ;;  %s45_s10 = int_to_ptr.vmem [resolvable:$true] %s44_s10 }
  0x25   :  { %p1285_p3 = scmp.lt.u32.totalorder %s1281_s13, %s1621_s2 }
  0x27   :  { %p1287_p4 = pnand %p1285_p3, %p1282_p2 }
  0x29   :  { %1290 = shalt.err (!%p1287_p4)
}
  0x2a   :  { %s1291_s18 = scalar_lea.vmem %s45_s10, 128  ;;  %p1296_p6 = scmp.lt.s32.totalorder %s45_s10, %s45_s10 }
  0x2b   :  { %p1292_p5 = scmp.ne.s32.totalorder %s45_s10, %s1291_s18  ;;  %p1297_p7 = scmp.lt.s32.totalorder %s1291_s18, %s1291_s18 }
  0x2d   :  { %p1298_p8 = por %p1297_p7, %p1296_p6 }
  0x2f   :  { %p1299_p9 = pnand %p1298_p8, %p1292_p5 }
  0x31   :  { %1302 = shalt.err (!%p1299_p9)
}
  0x32   :  { %47 = dma.hbm_to_vmem [thread:$0]  %s1621_s2, 128, %s45_s10, [#allocation7]  }
  0x33   :  { %1325 = dma.done.wait [#allocation4], 512  }
  0x34   :  { %1326 = vsyncadd [#allocation4], 4294966784 }
  0x35   :  { %1327 = dma.done.wait [#allocation7], 256  }
  0x36   :  { %1328 = vsyncadd [#allocation7], 4294967040  ;;  %v1336_v0 = vmov 0.0   ;;  %vm1337_vm0 = vmmov 0   ;;  %vm71_vm1 = vcmask 64512   ;;  %v69_v1 = vld [vmem:[#allocation3] sm:$0xff] }
  0x37   :  { %1084 = vmatprep.subr.mxu0 %v1336_v0  ;;  %1086 = vmatprep.mubr.msk.f32.mxu0 %vm1337_vm0, %v1336_v0  ;;  %v70_v2 = vld [vmem:[#allocation6] sm:$0xff]  ;;  %v1338_v4 = vmov 0   ;;  %v473_v7 = vld [vmem:[%s1624_s5 + $0x10] sm:$0xff]  ;;  %v1010_v8 = vld [vmem:[%s1626_s7 + $0x18] sm:$0xff]  ;;  %vm239_vm2 = vcmask 261120   ;;  %v1339_v28 = vmov 0.0|0.0  }
  0x38   :  { %1089 = vmatprep.subr.mxu1 %v1336_v0  ;;  %1091 = vmatprep.mubr.msk.f32.mxu1 %vm1337_vm0, %v1336_v0  ;;  %v147_v3 = vld [vmem:[%s1622_s3] sm:$0xff]  ;;  %v1012_v9 = vld [vmem:[%s1626_s7 + $0x28] sm:$0xff]  ;;  %v1023_v11 = vld [vmem:[%s1624_s5 + $0x38] sm:$0xff]  ;;  %s1340_s19 = smov [#allocation9]  }
  0x39   :  { %1085 = vmatpush3.msra.mxu0 %v69_v1  ;;  %1235 = vset.pattern.permute.xlu0 %v1338_v4  ;;  %v344_v5 = vld [vmem:[%s1626_s7] sm:$0xff]  ;;  %v1021_v10 = vld [vmem:[%s1624_s5 + $0x28] sm:$0xff]  ;;  %v1032_v12 = vld [vmem:[%s1626_s7 + $0x38] sm:$0xff]  ;;  %s977_s20 = sshll.u32 %s1340_s19, 4  ;;  %s978_s20 = int_to_ptr.vmem [resolvable:$true] %s977_s20 }
  0x3a   :  { %1087 = vmatmul.mubr.msk.f32.vlgmr.msra.gmra.mrb[0].mxu0 %vm71_vm1, %v70_v2  ;;  %1236 = vset.pattern.permute.xlu1 %v1338_v4  ;;  %v471_v6 = vld [vmem:[%s1624_s5] sm:$0xff]  ;;  %v146_v16 = vld [vmem:[#allocation8] sm:$0xff]  ;;  %v233_v26 = vld [vmem:[%s1623_s4 + $0x10] sm:$0xff]  ;;  %p1308_p11 = scmp.lt.s32.totalorder %s978_s20, %s978_s20 }
  0x3b   :  { %150 = vperm.xlu0 %1235, %v147_v3   ;;  %v231_v17 = vld [vmem:[%s1623_s4] sm:$0xff]  ;;  %v229_v22 = vld [vmem:[#allocation3 + $0x8] sm:$0xff]  ;;  %v234_v27 = vld [vmem:[%s1623_s4 + $0x18] sm:$0xff] }
  0x3c   :  { %1098 = vmatprep.mubr.msk.f32.mxu0 %vm239_vm2, %v231_v17  ;;  %v232_v25 = vld [vmem:[%s1623_s4 + $0x8] sm:$0xff]  ;;  %v346_v30 = vld [vmem:[%s1626_s7 + $0x10] sm:$0xff]  ;;  %v474_v32 = vld [vmem:[%s1624_s5 + $0x18] sm:$0xff] }
  0x3d   :  { %v345_v29 = vld [vmem:[%s1626_s7 + $0x8] sm:$0xff]  ;;  %v1011_v33 = vld [vmem:[%s1626_s7 + $0x20] sm:$0xff]  ;;  %v1022_v35 = vld [vmem:[%s1624_s5 + $0x30] sm:$0xff] }
  0x3e   :  { %354 = vperm.xlu1 %1236, %v345_v29   ;;  %v472_v31 = vld [vmem:[%s1624_s5 + $0x8] sm:$0xff]  ;;  %v1020_v34 = vld [vmem:[%s1624_s5 + $0x20] sm:$0xff]  ;;  %v1031_v36 = vld [vmem:[%s1626_s7 + $0x30] sm:$0xff] }
  0x3f   :  { %349 = vperm.xlu0 %1235, %v344_v5   ;;  %v1033_v37 = vld [vmem:[%s1626_s7 + $0x40] sm:$0xff]  ;;  %v342_v49 = vld [vmem:[%s1625_s6 + $0x8] sm:$0xff]  ;;  %v343_v50 = vld [vmem:[%s1625_s6 + $0x10] sm:$0xff] }
  0x40   :  { %v341_v48 = vld [vmem:[%s1625_s6] sm:$0xff]  ;;  %v460_v57 = vld [vmem:[#allocation3 + $0x10] sm:$0xff]  ;;  %v1007_v29 = vld [vmem:[%s1625_s6 + $0x18] sm:$0xff] }
  0x41   :  { %v999_v51 = vld [vmem:[%s1623_s4 + $0x20] sm:$0xff] }
  0x42   :  { %359 = vperm.xlu1 %1236, %v346_v30   ;;  %v1008_v30 = vld [vmem:[%s1625_s6 + $0x20] sm:$0xff] }
  0x43   :  { %477 = vperm.xlu0 %1235, %v471_v6  }
  0x46   :  { %482 = vperm.xlu1 %1236, %v472_v31   ;;  %v1009_v31 = vld [vmem:[%s1625_s6 + $0x28] sm:$0xff] }
  0x47   :  { %487 = vperm.xlu0 %1235, %v473_v7   ;;  %v1000_v7 = vld [vmem:[%s1623_s4 + $0x28] sm:$0xff] }
  0x4a   :  { %492 = vperm.xlu1 %1236, %v474_v32   ;;  %v1016_v32 = vld [vmem:[%s1623_s4 + $0x40] sm:$0xff] }
  0x4b   :  { %606 = vperm.xlu0 %1235, %v1010_v8   ;;  %v1001_v8 = vld [vmem:[%s1623_s4 + $0x30] sm:$0xff] }
  0x4e   :  { %611 = vperm.xlu1 %1236, %v1011_v33  }
  0x4f   :  { %616 = vperm.xlu0 %1235, %v1012_v9   ;;  %v1002_v9 = vld [vmem:[%s1623_s4 + $0x38] sm:$0xff] }
  0x52   :  { %735 = vperm.xlu1 %1236, %v1020_v34  }
  0x53   :  { %740 = vperm.xlu0 %1235, %v1021_v10  }
  0x56   :  { %745 = vperm.xlu1 %1236, %v1022_v35  }
  0x57   :  { %750 = vperm.xlu0 %1235, %v1023_v11  }
  0x5a   :  { %864 = vperm.xlu1 %1236, %v1031_v36  }
  0x5b   :  { %869 = vperm.xlu0 %1235, %v1032_v12  }
  0x5e   :  { %874 = vperm.xlu1 %1236, %v1033_v37   ;;  %v717_v37 = vld [vmem:[#allocation3 + $0x18] sm:$0xff] }
  0xba   :  { %v151_v18 = vpop.permute.xlu0 %150 }
  0xbd   :  { %v355_v56 = vpop.permute.xlu1 %354 }
  0xbe   :  { %v350_v52 = vpop.permute.xlu0 %349 }
  0xc1   :  { %v360_v1 = vpop.permute.xlu1 %359 }
  0xc2   :  { %v478_v11 = vpop.permute.xlu0 %477 }
  0xc5   :  { %v483_v10 = vpop.permute.xlu1 %482 }
  0xc9   :  { %v493_v17 = vpop.permute.xlu1 %492 }
 0x10d   :  { %v141_v13 = vpop.f32.mrb[0].mxu0 }
 0x10e   :  { %v145_v14 = vmax.f32 %v141_v13, 0.0  ;;  %v1088_v15 = vpop.f32.mrb[1].mxu0 }
 0x110   :  { %1090 = vmatpush3.msra.mxu1 %v145_v14 }
 0x111   :  { %1092 = vmatmul.mubr.msk.f32.vlgmr.msra.gmra.mrb[0].mxu1 %vm71_vm1, %v146_v16  ;;  %1187 = vmatprep.subr.bf16.mxu1 %v1339_v28 }
 0x112   :  { %1112 = vmatprep.mubr.msk.f32.mxu1 %vm1337_vm0, %v1336_v0 }
 0x1e4   :  { %v222_v19 = vpop.f32.mrb[0].mxu1 }
 0x1e5   :  { %v223_v20 = vadd.f32 %v222_v19, %v151_v18  ;;  %v1093_v21 = vpop.f32.mrb[1].mxu1 }
 0x1e7   :  { %v226_v23 = vmax.f32 %v223_v20, 0.0  ;;  %v488_v20 = vpop.permute.xlu0 %487 }
 0x1e9   :  { %227 = vst [vmem:[#allocation9] sm:$0xff] %v226_v23  ;;  %v1183_v24 = vpack.c.bf16 %v226_v23, %v229_v22 }
 0x1eb   :  { %1184 = vmatprep.subr.bf16.mxu0 %v1183_v24  ;;  %v607_v33 = vpop.permute.xlu0 %606 }
 0x1ec   :  { %1186 = vmatpush3.bf16.msra.mxu0 %v1183_v24 }
 0x1ef   :  { %1099 = vmatmul.mubr.msk.f32.vlgmr.msra.gmra.mrb[2].mxu0 %vm239_vm2, %v232_v25 }
 0x1f0   :  { %1101 = vmatprep.mubr.msk.f32.mxu0 %vm239_vm2, %v233_v26 }
 0x1f3   :  { %1102 = vmatmul.mubr.msk.f32.gmra.mrb[4].mxu0 %vm239_vm2, %v234_v27 }
 0x1f4   :  { %1129 = vmatprep.mubr.msk.f32.mxu0 %vm239_vm2, %v999_v51  ;;  %v1017_v51 = vld [vmem:[%s1623_s4 + $0x48] sm:$0xff] }
 0x2c2   :  { %v1100_v38 = vpop.f32.mrb[2].mxu0 }
 0x2c3   :  { %v338_v39 = vmax.f32 %v1100_v38, 0.0  ;;  %v318_v40 = vpop.f32.mrb[3].mxu0 }
 0x2c4   :  { %v337_v41 = vmax.f32 %v318_v40, 0.0 }
 0x2c6   :  { %v1188_v42 = vpack.c.bf16 %v338_v39, %v337_v41  ;;  %v1103_v43 = vpop.f32.mrb[4].mxu0  ;;  %v612_v39 = vpop.permute.xlu1 %611 }
 0x2c7   :  { %v340_v44 = vmax.f32 %v1103_v43, 0.0  ;;  %v328_v45 = vpop.f32.mrb[5].mxu0 }
 0x2c8   :  { %v339_v46 = vmax.f32 %v328_v45, 0.0  ;;  %1189 = vmatpush3.bf16.msra.mxu1 %v1188_v42  ;;  %v617_v45 = vpop.permute.xlu0 %616 }
 0x2c9   :  { %1190 = vmatprep.subr.bf16.mxu1 %v1339_v28 }
 0x2ca   :  { %v1191_v47 = vpack.c.bf16 %v340_v44, %v339_v46 }
 0x2cc   :  { %1192 = vmatpush3.bf16.msra.mxu1 %v1191_v47 }
 0x2cf   :  { %1113 = vmatmul.mubr.msk.f32.vlgmr.msra.gmra.mrb[2].mxu1 %vm239_vm2, %v341_v48 }
 0x2d0   :  { %1115 = vmatprep.mubr.msk.f32.mxu1 %vm1337_vm0, %v1336_v0 }
 0x2d3   :  { %1116 = vmatmul.mubr.msk.f32.gmra.mrb[4].mxu1 %vm239_vm2, %v342_v49 }
 0x2d4   :  { %1118 = vmatprep.mubr.msk.f32.mxu1 %vm1337_vm0, %v1336_v0 }
 0x2d7   :  { %1119 = vmatmul.mubr.msk.f32.gmra.mrb[6].mxu1 %vm239_vm2, %v343_v50 }
 0x2d8   :  { %1160 = vmatprep.mubr.msk.f32.mxu1 %vm239_vm2, %v1016_v32 }
 0x3a2   :  { %v437_v53 = vpop.f32.mrb[2].mxu1 }
 0x3a3   :  { %v438_v54 = vadd.f32 %v437_v53, %v350_v52  ;;  %v1114_v55 = vpop.f32.mrb[3].mxu1  ;;  %v1018_v52 = vld [vmem:[%s1623_s4 + $0x50] sm:$0xff]  ;;  %v1019_v53 = vld [vmem:[%s1623_s4 + $0x58] sm:$0xff] }
 0x3a4   :  { %v736_v55 = vpop.permute.xlu1 %735 }
 0x3a5   :  { %v451_v58 = vmax.f32 %v438_v54, 0.0  ;;  %v741_v54 = vpop.permute.xlu0 %740 }
 0x3a6   :  { %v442_v59 = vpop.f32.mrb[4].mxu1 }
 0x3a7   :  { %454 = vst [vmem:[#allocation9 + $0x8] sm:$0xff] %v451_v58  ;;  %v1193_v60 = vpack.c.bf16 %v451_v58, %v460_v57  ;;  %v443_v61 = vadd.f32 %v442_v59, %v355_v56  ;;  %v1117_v62 = vpop.f32.mrb[5].mxu1 }
 0x3a9   :  { %v452_v63 = vmax.f32 %v443_v61, 0.0  ;;  %1194 = vmatprep.subr.bf16.mxu0 %v1193_v60  ;;  %v751_v61 = vpop.permute.xlu0 %750 }
 0x3aa   :  { %v447_v2 = vpop.f32.mrb[6].mxu1  ;;  %1196 = vmatpush3.bf16.msra.mxu0 %v1193_v60 }
 0x3ab   :  { %455 = vst [vmem:[#allocation9 + $0x10] sm:$0xff] %v452_v63  ;;  %v448_v3 = vadd.f32 %v447_v2, %v360_v1  ;;  %v1120_v4 = vpop.f32.mrb[7].mxu1  ;;  %v746_v1 = vpop.permute.xlu1 %745 }
 0x3ad   :  { %v453_v5 = vmax.f32 %v448_v3, 0.0 }
 0x3af   :  { %456 = vst [vmem:[#allocation9 + $0x18] sm:$0xff] %v453_v5  ;;  %v1197_v6 = vpack.c.bf16 %v453_v5, %v452_v63 }
 0x3b1   :  { %1198 = vmatprep.subr.bf16.mxu0 %v1197_v6 }
 0x3b2   :  { %1200 = vmatpush3.bf16.msra.mxu0 %v1197_v6 }
 0x3b3   :  { %1201 = vmatprep.subr.bf16.mxu0 %v1339_v28 }
 0x3b5   :  { %1130 = vmatmul.mubr.msk.f32.vlgmr.msra.gmra.mrb[6].mxu0 %vm239_vm2, %v1000_v7 }
 0x3b6   :  { %1132 = vmatprep.mubr.msk.f32.mxu0 %vm239_vm2, %v1001_v8 }
 0x3b9   :  { %1133 = vmatmul.mubr.msk.f32.gmra.mrb[8].mxu0 %vm239_vm2, %v1002_v9  ;;  %v1028_v9 = vld [vmem:[%s1625_s6 + $0x30] sm:$0xff] }
 0x3ba   :  { %1143 = vmatprep.mubr.msk.f32.mxu0 %vm1337_vm0, %v1336_v0 }
 0x488   :  { %v1131_v12 = vpop.f32.mrb[6].mxu0 }
 0x489   :  { %v579_v13 = vadd.f32 %v1131_v12, %v483_v10  ;;  %v573_v14 = vpop.f32.mrb[7].mxu0  ;;  %v1029_v10 = vld [vmem:[%s1625_s6 + $0x38] sm:$0xff]  ;;  %v870_v12 = vpop.permute.xlu0 %869 }
 0x48a   :  { %v574_v15 = vadd.f32 %v573_v14, %v478_v11  ;;  %v865_v11 = vpop.permute.xlu1 %864 }
 0x48b   :  { %v593_v16 = vmax.f32 %v579_v13, 0.0 }
 0x48c   :  { %v592_v18 = vmax.f32 %v574_v15, 0.0  ;;  %v1134_v19 = vpop.f32.mrb[8].mxu0 }
 0x48d   :  { %v589_v21 = vadd.f32 %v1134_v19, %v493_v17  ;;  %v583_v22 = vpop.f32.mrb[9].mxu0 }
 0x48e   :  { %v1202_v23 = vpack.c.bf16 %v593_v16, %v592_v18  ;;  %v584_v24 = vadd.f32 %v583_v22, %v488_v20 }
 0x48f   :  { %v595_v25 = vmax.f32 %v589_v21, 0.0  ;;  %v875_v21 = vpop.permute.xlu1 %874 }
 0x490   :  { %v594_v26 = vmax.f32 %v584_v24, 0.0  ;;  %1203 = vmatpush3.bf16.msra.mxu0 %v1202_v23 }
 0x491   :  { %1204 = vmatprep.subr.bf16.mxu0 %v1339_v28 }
 0x492   :  { %v1205_v27 = vpack.c.bf16 %v595_v25, %v594_v26 }
 0x494   :  { %1206 = vmatpush3.bf16.msra.mxu0 %v1205_v27 }
 0x495   :  { %1215 = vmatprep.subr.bf16.mxu0 %v1339_v28 }
 0x497   :  { %1144 = vmatmul.mubr.msk.f32.vlgmr.msra.gmra.mrb[10].mxu0 %vm239_vm2, %v1007_v29 }
 0x498   :  { %1146 = vmatprep.mubr.msk.f32.mxu0 %vm1337_vm0, %v1336_v0 }
 0x49b   :  { %1147 = vmatmul.mubr.msk.f32.gmra.mrb[12].mxu0 %vm239_vm2, %v1008_v30 }
 0x49c   :  { %1149 = vmatprep.mubr.msk.f32.mxu0 %vm1337_vm0, %v1336_v0 }
 0x49f   :  { %1150 = vmatmul.mubr.msk.f32.gmra.mrb[14].mxu0 %vm239_vm2, %v1009_v31 }
 0x4a0   :  { %1174 = vmatprep.mubr.msk.f32.mxu0 %vm1337_vm0, %v1336_v0 }
 0x56a   :  { %v694_v34 = vpop.f32.mrb[10].mxu0 }
 0x56b   :  { %v695_v35 = vadd.f32 %v694_v34, %v607_v33  ;;  %v1145_v36 = vpop.f32.mrb[11].mxu0 }
 0x56d   :  { %v708_v38 = vmax.f32 %v695_v35, 0.0 }
 0x56e   :  { %v699_v40 = vpop.f32.mrb[12].mxu0 }
 0x56f   :  { %711 = vst [vmem:[#allocation9 + $0x20] sm:$0xff] %v708_v38  ;;  %v1207_v41 = vpack.c.bf16 %v708_v38, %v717_v37  ;;  %v700_v42 = vadd.f32 %v699_v40, %v612_v39  ;;  %v1148_v43 = vpop.f32.mrb[13].mxu0 }
 0x571   :  { %v709_v44 = vmax.f32 %v700_v42, 0.0  ;;  %1208 = vmatprep.subr.bf16.mxu1 %v1207_v41 }
 0x572   :  { %v704_v46 = vpop.f32.mrb[14].mxu0  ;;  %1210 = vmatpush3.bf16.msra.mxu1 %v1207_v41 }
 0x573   :  { %712 = vst [vmem:[#allocation9 + $0x28] sm:$0xff] %v709_v44  ;;  %v705_v47 = vadd.f32 %v704_v46, %v617_v45  ;;  %v1151_v48 = vpop.f32.mrb[15].mxu0 }
 0x575   :  { %v710_v49 = vmax.f32 %v705_v47, 0.0 }
 0x577   :  { %713 = vst [vmem:[#allocation9 + $0x30] sm:$0xff] %v710_v49  ;;  %v1211_v50 = vpack.c.bf16 %v710_v49, %v709_v44 }
 0x579   :  { %1212 = vmatprep.subr.bf16.mxu1 %v1211_v50 }
 0x57a   :  { %1214 = vmatpush3.bf16.msra.mxu1 %v1211_v50 }
 0x57b   :  { %1221 = vmatprep.subr.bf16.mxu1 %v1339_v28 }
 0x57d   :  { %1161 = vmatmul.mubr.msk.f32.vlgmr.msra.gmra.mrb[8].mxu1 %vm239_vm2, %v1017_v51 }
 0x57e   :  { %1163 = vmatprep.mubr.msk.f32.mxu1 %vm239_vm2, %v1018_v52 }
 0x581   :  { %1164 = vmatmul.mubr.msk.f32.gmra.mrb[10].mxu1 %vm239_vm2, %v1019_v53 }
 0x582   :  { %1177 = vmatprep.mubr.msk.f32.mxu1 %vm1337_vm0, %v1336_v0 }
 0x650   :  { %v1162_v56 = vpop.f32.mrb[8].mxu1 }
 0x651   :  { %v837_v57 = vadd.f32 %v1162_v56, %v741_v54  ;;  %v831_v58 = vpop.f32.mrb[9].mxu1 }
 0x652   :  { %v832_v59 = vadd.f32 %v831_v58, %v736_v55 }
 0x653   :  { %v851_v60 = vmax.f32 %v837_v57, 0.0 }
 0x654   :  { %v850_v62 = vmax.f32 %v832_v59, 0.0  ;;  %v1165_v63 = vpop.f32.mrb[10].mxu1 }
 0x655   :  { %v847_v2 = vadd.f32 %v1165_v63, %v751_v61  ;;  %v841_v3 = vpop.f32.mrb[11].mxu1 }
 0x656   :  { %v1216_v4 = vpack.c.bf16 %v851_v60, %v850_v62  ;;  %v842_v5 = vadd.f32 %v841_v3, %v746_v1 }
 0x657   :  { %v853_v6 = vmax.f32 %v847_v2, 0.0 }
 0x658   :  { %v852_v7 = vmax.f32 %v842_v5, 0.0  ;;  %1217 = vmatpush3.bf16.msra.mxu0 %v1216_v4  ;;  %1223 = vmatpush3.bf16.msra.mxu1 %v1216_v4 }
 0x659   :  { %1218 = vmatprep.subr.bf16.mxu0 %v1339_v28  ;;  %1222 = vmatprep.subr.bf16.mxu1 %v1339_v28  ;;  %v1030_v28 = vld [vmem:[%s1625_s6 + $0x40] sm:$0xff]  ;;  %s1303_s6 = scalar_lea.vmem %s978_s20, 1280 }
 0x65a   :  { %v1219_v8 = vpack.c.bf16 %v853_v6, %v852_v7  ;;  %p1304_p10 = scmp.ne.s32.totalorder %s978_s20, %s1303_s6  ;;  %p1309_p12 = scmp.lt.s32.totalorder %s1303_s6, %s1303_s6 }
 0x65c   :  { %1220 = vmatpush3.bf16.msra.mxu0 %v1219_v8  ;;  %1224 = vmatpush3.bf16.msra.mxu1 %v1219_v8  ;;  %p1310_p13 = por %p1309_p12, %p1308_p11 }
 0x65e   :  { %p1311_p0 = pnand %p1310_p13, %p1304_p10 }
 0x65f   :  { %1175 = vmatmul.mubr.msk.f32.vlgmr.msra.gmra.mrb[16].mxu0 %vm239_vm2, %v1028_v9  ;;  %1178 = vmatmul.mubr.msk.f32.vlgmr.msra.gmra.mrb[12].mxu1 %vm239_vm2, %v1029_v10 }
 0x660   :  { %1180 = vmatprep.mubr.msk.f32.mxu1 %vm1337_vm0, %v1336_v0 }
 0x663   :  { %1181 = vmatmul.mubr.msk.f32.gmra.mrb[14].mxu1 %vm239_vm2, %v1030_v28 }
 0x732   :  { %v952_v13 = vpop.f32.mrb[16].mxu0  ;;  %v957_v14 = vpop.f32.mrb[12].mxu1 }
 0x733   :  { %v953_v15 = vadd.f32 %v952_v13, %v865_v11  ;;  %v958_v16 = vadd.f32 %v957_v14, %v870_v12  ;;  %v1179_v17 = vpop.f32.mrb[13].mxu1  ;;  %v1176_v18 = vpop.f32.mrb[17].mxu0 }
 0x735   :  { %v966_v19 = vmax.f32 %v953_v15, 0.0  ;;  %v967_v20 = vmax.f32 %v958_v16, 0.0 }
 0x736   :  { %v962_v22 = vpop.f32.mrb[14].mxu1 }
 0x737   :  { %969 = vst [vmem:[#allocation9 + $0x38] sm:$0xff] %v966_v19  ;;  %970 = vst [vmem:[#allocation9 + $0x40] sm:$0xff] %v967_v20  ;;  %v963_v0 = vadd.f32 %v962_v22, %v875_v21  ;;  %v1182_v23 = vpop.f32.mrb[15].mxu1 }
 0x739   :  { %v968_v24 = vmax.f32 %v963_v0, 0.0 }
 0x73b   :  { %971 = vst [vmem:[#allocation9 + $0x48] sm:$0xff] %v968_v24 }
 0x73c   :  { %1314 = shalt.err (!%p1311_p0)
}
 0x73d   :  { %s1315_s23 = scalar_lea.hbm %s1627_s8, 1280 }
 0x73e   :  { %p1316_p1 = scmp.ne.s32.totalorder %s1627_s8, %s1315_s23  ;;  %p1319_p2 = scmp.lt.u32.totalorder %s1315_s23, %s1627_s8 }
 0x740   :  { %p1321_p3 = pnand %p1319_p2, %p1316_p1 }
 0x742   :  { %1324 = shalt.err (!%p1321_p3)
}
 0x743   :  { %983 = dma.vmem_to_hbm [thread:$0]  %s978_s20, 1280, %s1627_s8, [#allocation5], %s1333_s1, %s1333_s1, %s1334_s27  }
 0x744   :  { %1329 = dma.done.wait [#allocation5], 1280  }
 0x745   :  { %1330 = vsyncadd [#allocation5], 4294966016 }
 0x746   :  { %987 = vsyncpa [#allocation4], 1 }
 0x747   :  { %988 = vsyncpa [#allocation7], 1 }
 0x748   :  { %989 = vsyncpa [#allocation5], 1 }

</bundles_post_ra>
